<compile_context>
chip_gen: v7x
topology: tpu7x:2x2x1
jax: 0.10.0
libtpu: 0.0.40
codegen_flags: <defaults>
</compile_context>

<pallas_src>
import math

import jax
import jax.numpy as jnp
from jax import lax
from jax.experimental import pallas as pl
from jax.experimental.pallas import tpu as pltpu


# -----------------------------------------------------------------------------
# Fused kernel:
#   AdjAttenAgger:
#     Q = main @ Wq + bq ; K = other @ Wk + bk
#     A = softmax(mask_fill(Q K^T / sqrt(mid), -(1<<32)))
#     agg = A @ other
#   Head:
#     g = L2norm(agg @ Wg + bg)
#     d = L2norm(relu(desc @ W1 + b1) @ W2 + b2)
#     logits = logit_scale * g @ d^T
# -----------------------------------------------------------------------------
def desc_align_kernel(proj_ref, main_ref, other_ref, desc_ref,
                      wq_ref, bq_ref, wk_ref, bk_ref,
                      wg_ref, bg_ref, w1_ref, b1_ref, w2_ref, b2_ref,
                      scale_ref, out_ref):
    mid_dim = wq_ref.shape[1]
    inv_sqrt_mid = jnp.float32(1.0 / math.sqrt(mid_dim))

    # ---- aggregator ----
    q = jnp.dot(main_ref[...], wq_ref[...],
                preferred_element_type=jnp.float32) + bq_ref[...]
    k = jnp.dot(other_ref[...], wk_ref[...],
                preferred_element_type=jnp.float32) + bk_ref[...]
    # Fold 1/sqrt(mid) into Q (smaller than the attention matrix in general).
    q = q * inv_sqrt_mid
    # Contract last dims directly (no materialized transpose of K).
    attn = lax.dot_general(q, k, (((1,), (1,)), ((), ())),
                           preferred_element_type=jnp.float32)
    # torch: masked_fill(Attn, logical_not(proj > 0), -(1 << 32))
    mask = jnp.logical_not(proj_ref[...] > 0.0)
    attn = jnp.where(mask, jnp.float32(-(1 << 32)), attn)
    attn = attn - jnp.max(attn, axis=-1, keepdims=True)
    p = jnp.exp(attn)
    p = p * pl.reciprocal(jnp.sum(p, axis=-1, keepdims=True), approx=True)
    agg = jnp.dot(p, other_ref[...], preferred_element_type=jnp.float32)

    # ---- projection heads + L2 norm + contrastive logits ----
    g = jnp.dot(agg, wg_ref[...],
                preferred_element_type=jnp.float32) + bg_ref[...]
    h = jnp.dot(desc_ref[...], w1_ref[...],
                preferred_element_type=jnp.float32) + b1_ref[...]
    h = jnp.maximum(h, jnp.float32(0.0))
    d = jnp.dot(h, w2_ref[...], preferred_element_type=jnp.float32) + b2_ref[...]
    g = g * lax.rsqrt(jnp.sum(g * g, axis=-1, keepdims=True))
    d = d * lax.rsqrt(jnp.sum(d * d, axis=-1, keepdims=True))
    # Fold logit_scale into g (n_mol x 64) instead of the (n_mol x n_desc) output.
    g = g * scale_ref[0]
    out_ref[...] = lax.dot_general(g, d, (((1,), (1,)), ((), ())),
                                   preferred_element_type=jnp.float32)


def desc_align_forward(mole_features, sub_features, sub_projection_matrix,
                       desc_features, params):
    """Pallas version of Desc_align.forward, downstream of the encoders."""
    # TODO(synk): mole_encoder / SAB / clip_net.encode_text / RDKit graph
    # construction are external models; their outputs are the inputs here.
    n = mole_features.shape[0]
    b = desc_features.shape[0]

    def vmem_spec(a):
        nd = a.ndim
        return pl.BlockSpec(a.shape, lambda i, _nd=nd: (0,) * _nd)

    args = (sub_projection_matrix, mole_features, sub_features, desc_features,
            params["wq_t"], params["bq"], params["wk_t"], params["bk"],
            params["wg_t"], params["bg"], params["w1_t"], params["b1"],
            params["w2_t"], params["b2"])
    in_specs = [vmem_spec(a) for a in args] + [
        pl.BlockSpec(memory_space=pltpu.MemorySpace.SMEM)]   # logit_scale scalar

    return pl.pallas_call(
        desc_align_kernel,
        out_shape=jax.ShapeDtypeStruct((n, b), jnp.float32),
        grid=(1,),
        in_specs=in_specs,
        out_specs=pl.BlockSpec((n, b), lambda i: (0, 0)),
        compiler_params=pltpu.CompilerParams(
            dimension_semantics=("arbitrary",)),
    )(*args, params["logit_scale"])


def desc_align_reference(mole_features, sub_features, sub_projection_matrix,
                         desc_features, params):
    """Pure-JAX reference (mirrors the torch forward) for validation."""
    mid = params["wq_t"].shape[1]
    q = mole_features @ params["wq_t"] + params["bq"]
    k = sub_features @ params["wk_t"] + params["bk"]
    attn = (q @ k.T) / math.sqrt(mid)
    mask = jnp.logical_not(sub_projection_matrix > 0.0)
    attn = jnp.where(mask, jnp.float32(-(1 << 32)), attn)
    attn = jax.nn.softmax(attn, axis=-1)
    agg = attn @ sub_features
    g = agg @ params["wg_t"] + params["bg"]
    h = jnp.maximum(desc_features @ params["w1_t"] + params["b1"], 0.0)
    d = h @ params["w2_t"] + params["b2"]
    g = g / jnp.linalg.norm(g, axis=1, keepdims=True)
    d = d / jnp.linalg.norm(d, axis=1, keepdims=True)
    return params["logit_scale"][0] * (g @ d.T)


def init_linear(key, fan_in, fan_out):
    kw, kb = jax.random.split(key)
    bound = 1.0 / math.sqrt(fan_in)
    w_t = jax.random.uniform(kw, (fan_in, fan_out), jnp.float32, -bound, bound)
    b = jax.random.uniform(kb, (1, fan_out), jnp.float32, -bound, bound)
    return w_t, b


if __name__ == "__main__":
    key = jax.random.PRNGKey(0)
    emb_dim = 32        # emb_dim of the module
    mid_dim = emb_dim   # max(emb_dim, emb_dim)
    n_mol, n_sub, n_desc = 8, 8, 8

    keys = jax.random.split(key, 10)
    # Stand-ins for the encoder outputs:
    mole_features = jax.random.normal(keys[0], (n_mol, emb_dim), jnp.float32)
    sub_features = jax.random.normal(keys[1], (n_sub, emb_dim), jnp.float32)
    desc_features = jax.random.normal(keys[2], (n_desc, 512), jnp.float32)
    # Synthetic substructure projection matrix (>=1 positive per molecule row).
    proj = (jax.random.uniform(keys[3], (n_mol, n_sub)) > 0.5).astype(jnp.float32)
    proj = proj.at[:, 0].set(1.0)

    wq_t, bq = init_linear(keys[4], emb_dim, mid_dim)   # aggregator.Qdense
    wk_t, bk = init_linear(keys[5], emb_dim, mid_dim)   # aggregator.Kdense
    wg_t, bg = init_linear(keys[6], emb_dim, 64)        # graph_linear
    w1_t, b1 = init_linear(keys[7], 512, 256)           # desc_linear[0]
    w2_t, b2 = init_linear(keys[8], 256, 64)            # desc_linear[2]
    logit_scale = jnp.exp(
        jnp.float32(math.log(1.0 / 0.07))).reshape(1)   # CLIP logit_scale.exp()

    params = dict(wq_t=wq_t, bq=bq, wk_t=wk_t, bk=bk,
                  wg_t=wg_t, bg=bg, w1_t=w1_t, b1=b1, w2_t=w2_t, b2=b2,
                  logit_scale=logit_scale)

    logits = desc_align_forward(mole_features, sub_features, proj,
                                desc_features, params)
    jax.block_until_ready(logits)

    ref = desc_align_reference(mole_features, sub_features, proj,
                               desc_features, params)
    assert logits.shape == (n_mol, n_desc) and logits.dtype == jnp.float32
    assert bool(jnp.all(jnp.isfinite(logits)))
    assert bool(jnp.allclose(logits, ref, rtol=1e-2, atol=5e-2))
    print("KERNEL_OK")
</pallas_src>

<mosaic_0001>
module attributes {stable_mosaic.version = 11 : i64} {
  func.func @desc_align_kernel(%arg0: i32, %arg1: memref<8x8xf32, #tpu.memory_space<vmem>>, %arg2: memref<8x32xf32, #tpu.memory_space<vmem>>, %arg3: memref<8x32xf32, #tpu.memory_space<vmem>>, %arg4: memref<8x512xf32, #tpu.memory_space<vmem>>, %arg5: memref<32x32xf32, #tpu.memory_space<vmem>>, %arg6: memref<1x32xf32, #tpu.memory_space<vmem>>, %arg7: memref<32x32xf32, #tpu.memory_space<vmem>>, %arg8: memref<1x32xf32, #tpu.memory_space<vmem>>, %arg9: memref<32x64xf32, #tpu.memory_space<vmem>>, %arg10: memref<1x64xf32, #tpu.memory_space<vmem>>, %arg11: memref<512x256xf32, #tpu.memory_space<vmem>>, %arg12: memref<1x256xf32, #tpu.memory_space<vmem>>, %arg13: memref<256x64xf32, #tpu.memory_space<vmem>>, %arg14: memref<1x64xf32, #tpu.memory_space<vmem>>, %arg15: memref<1xf32, #tpu.memory_space<smem>>, %arg16: memref<8x8xf32, #tpu.memory_space<vmem>>) attributes {dimension_semantics = [#tpu.dimension_semantics<arbitrary>], iteration_bounds = array<i64: 1>, scalar_prefetch = 0 : i64, scratch_operands = 0 : i64, tpu.core_type = #tpu.core_type<tc>, window_params = [{pipeline_mode = #tpu.pipeline_mode<synchronous>, transform_indices = @transform_0, window_bounds = array<i64: 8, 8>}, {pipeline_mode = #tpu.pipeline_mode<synchronous>, transform_indices = @transform_1, window_bounds = array<i64: 8, 32>}, {pipeline_mode = #tpu.pipeline_mode<synchronous>, transform_indices = @transform_2, window_bounds = array<i64: 8, 32>}, {pipeline_mode = #tpu.pipeline_mode<synchronous>, transform_indices = @transform_3, window_bounds = array<i64: 8, 512>}, {pipeline_mode = #tpu.pipeline_mode<synchronous>, transform_indices = @transform_4, window_bounds = array<i64: 32, 32>}, {pipeline_mode = #tpu.pipeline_mode<synchronous>, transform_indices = @transform_5, window_bounds = array<i64: 1, 32>}, {pipeline_mode = #tpu.pipeline_mode<synchronous>, transform_indices = @transform_6, window_bounds = array<i64: 32, 32>}, {pipeline_mode = #tpu.pipeline_mode<synchronous>, transform_indices = @transform_7, window_bounds = array<i64: 1, 32>}, {pipeline_mode = #tpu.pipeline_mode<synchronous>, transform_indices = @transform_8, window_bounds = array<i64: 32, 64>}, {pipeline_mode = #tpu.pipeline_mode<synchronous>, transform_indices = @transform_9, window_bounds = array<i64: 1, 64>}, {pipeline_mode = #tpu.pipeline_mode<synchronous>, transform_indices = @transform_10, window_bounds = array<i64: 512, 256>}, {pipeline_mode = #tpu.pipeline_mode<synchronous>, transform_indices = @transform_11, window_bounds = array<i64: 1, 256>}, {pipeline_mode = #tpu.pipeline_mode<synchronous>, transform_indices = @transform_12, window_bounds = array<i64: 256, 64>}, {pipeline_mode = #tpu.pipeline_mode<synchronous>, transform_indices = @transform_13, window_bounds = array<i64: 1, 64>}, {transform_indices = @transform_14, window_bounds = array<i64: 1>}, {pipeline_mode = #tpu.pipeline_mode<synchronous>, transform_indices = @transform_15, window_bounds = array<i64: 8, 8>}]} {
    %c0 = arith.constant 0 : index
    %c0_0 = arith.constant 0 : index
    %0 = vector.load %arg2[%c0, %c0_0] : memref<8x32xf32, #tpu.memory_space<vmem>>, vector<8x32xf32>
    %c0_1 = arith.constant 0 : index
    %c0_2 = arith.constant 0 : index
    %1 = vector.load %arg5[%c0_1, %c0_2] : memref<32x32xf32, #tpu.memory_space<vmem>>, vector<32x32xf32>
    %cst = arith.constant dense<0.000000e+00> : vector<8x32xf32>
    %2 = tpu.matmul %0, %1, %cst {dimension_numbers = #tpu.dot_dimension_numbers<[1], [0], [0], [1], [0, 0, 1, 1], [], []>} : vector<8x32xf32>, vector<32x32xf32>, vector<8x32xf32> -> vector<8x32xf32>
    %c0_3 = arith.constant 0 : index
    %c0_4 = arith.constant 0 : index
    %3 = vector.load %arg6[%c0_3, %c0_4] : memref<1x32xf32, #tpu.memory_space<vmem>>, vector<1x32xf32>
    %4 = vector.broadcast %3 : vector<1x32xf32> to vector<8x32xf32>
    %5 = arith.addf %2, %4 : vector<8x32xf32>
    %c0_5 = arith.constant 0 : index
    %c0_6 = arith.constant 0 : index
    %6 = vector.load %arg3[%c0_5, %c0_6] : memref<8x32xf32, #tpu.memory_space<vmem>>, vector<8x32xf32>
    %c0_7 = arith.constant 0 : index
    %c0_8 = arith.constant 0 : index
    %7 = vector.load %arg7[%c0_7, %c0_8] : memref<32x32xf32, #tpu.memory_space<vmem>>, vector<32x32xf32>
    %cst_9 = arith.constant dense<0.000000e+00> : vector<8x32xf32>
    %8 = tpu.matmul %6, %7, %cst_9 {dimension_numbers = #tpu.dot_dimension_numbers<[1], [0], [0], [1], [0, 0, 1, 1], [], []>} : vector<8x32xf32>, vector<32x32xf32>, vector<8x32xf32> -> vector<8x32xf32>
    %c0_10 = arith.constant 0 : index
    %c0_11 = arith.constant 0 : index
    %9 = vector.load %arg8[%c0_10, %c0_11] : memref<1x32xf32, #tpu.memory_space<vmem>>, vector<1x32xf32>
    %10 = vector.broadcast %9 : vector<1x32xf32> to vector<8x32xf32>
    %11 = arith.addf %8, %10 : vector<8x32xf32>
    %cst_12 = arith.constant 0.176776692 : f32
    %12 = vector.broadcast %cst_12 : f32 to vector<8x32xf32>
    %13 = arith.mulf %5, %12 : vector<8x32xf32>
    %cst_13 = arith.constant dense<0.000000e+00> : vector<8x8xf32>
    %14 = tpu.matmul %13, %11, %cst_13 {dimension_numbers = #tpu.dot_dimension_numbers<[1], [1], [0], [0], [0, 0, 1, 0], [], []>} : vector<8x32xf32>, vector<8x32xf32>, vector<8x8xf32> -> vector<8x8xf32>
    %c0_14 = arith.constant 0 : index
    %c0_15 = arith.constant 0 : index
    %15 = vector.load %arg1[%c0_14, %c0_15] : memref<8x8xf32, #tpu.memory_space<vmem>>, vector<8x8xf32>
    %cst_16 = arith.constant 0.000000e+00 : f32
    %16 = vector.broadcast %cst_16 : f32 to vector<8x8xf32>
    %17 = arith.cmpf ogt, %15, %16 : vector<8x8xf32>
    %cst_17 = arith.constant dense<true> : vector<8x8xi1>
    %18 = arith.xori %17, %cst_17 : vector<8x8xi1>
    %cst_18 = arith.constant -4.2949673E+9 : f32
    %19 = vector.broadcast %cst_18 : f32 to vector<8x8xf32>
    %20 = arith.select %18, %19, %14 : vector<8x8xi1>, vector<8x8xf32>
    %cst_19 = arith.constant dense<0xFF800000> : vector<8xf32>
    %21 = vector.multi_reduction <maximumf>, %20, %cst_19 [1] : vector<8x8xf32> to vector<8xf32>
    %22 = vector.shape_cast %21 : vector<8xf32> to vector<8x1xf32>
    %23 = vector.broadcast %22 : vector<8x1xf32> to vector<8x8xf32>
    %24 = arith.subf %20, %23 : vector<8x8xf32>
    %25 = math.exp %24 : vector<8x8xf32>
    %cst_20 = arith.constant dense<0.000000e+00> : vector<8xf32>
    %26 = vector.multi_reduction <add>, %25, %cst_20 [1] : vector<8x8xf32> to vector<8xf32>
    %27 = vector.shape_cast %26 : vector<8xf32> to vector<8x1xf32>
    %28 = tpu.reciprocal %27 {approx = true} : vector<8x1xf32> -> vector<8x1xf32>
    %29 = vector.broadcast %28 : vector<8x1xf32> to vector<8x8xf32>
    %30 = arith.mulf %25, %29 : vector<8x8xf32>
    %c0_21 = arith.constant 0 : index
    %c0_22 = arith.constant 0 : index
    %31 = vector.load %arg3[%c0_21, %c0_22] : memref<8x32xf32, #tpu.memory_space<vmem>>, vector<8x32xf32>
    %cst_23 = arith.constant dense<0.000000e+00> : vector<8x32xf32>
    %32 = tpu.matmul %30, %31, %cst_23 {dimension_numbers = #tpu.dot_dimension_numbers<[1], [0], [0], [1], [0, 0, 1, 1], [], []>} : vector<8x8xf32>, vector<8x32xf32>, vector<8x32xf32> -> vector<8x32xf32>
    %c0_24 = arith.constant 0 : index
    %c0_25 = arith.constant 0 : index
    %33 = vector.load %arg9[%c0_24, %c0_25] : memref<32x64xf32, #tpu.memory_space<vmem>>, vector<32x64xf32>
    %cst_26 = arith.constant dense<0.000000e+00> : vector<8x64xf32>
    %34 = tpu.matmul %32, %33, %cst_26 {dimension_numbers = #tpu.dot_dimension_numbers<[1], [0], [0], [1], [0, 0, 1, 1], [], []>} : vector<8x32xf32>, vector<32x64xf32>, vector<8x64xf32> -> vector<8x64xf32>
    %c0_27 = arith.constant 0 : index
    %c0_28 = arith.constant 0 : index
    %35 = vector.load %arg10[%c0_27, %c0_28] : memref<1x64xf32, #tpu.memory_space<vmem>>, vector<1x64xf32>
    %36 = vector.broadcast %35 : vector<1x64xf32> to vector<8x64xf32>
    %37 = arith.addf %34, %36 : vector<8x64xf32>
    %c0_29 = arith.constant 0 : index
    %c0_30 = arith.constant 0 : index
    %38 = vector.load %arg4[%c0_29, %c0_30] : memref<8x512xf32, #tpu.memory_space<vmem>>, vector<8x512xf32>
    %c0_31 = arith.constant 0 : index
    %c0_32 = arith.constant 0 : index
    %39 = vector.load %arg11[%c0_31, %c0_32] : memref<512x256xf32, #tpu.memory_space<vmem>>, vector<512x256xf32>
    %cst_33 = arith.constant dense<0.000000e+00> : vector<8x256xf32>
    %40 = tpu.matmul %38, %39, %cst_33 {dimension_numbers = #tpu.dot_dimension_numbers<[1], [0], [0], [1], [0, 0, 1, 1], [], []>} : vector<8x512xf32>, vector<512x256xf32>, vector<8x256xf32> -> vector<8x256xf32>
    %c0_34 = arith.constant 0 : index
    %c0_35 = arith.constant 0 : index
    %41 = vector.load %arg12[%c0_34, %c0_35] : memref<1x256xf32, #tpu.memory_space<vmem>>, vector<1x256xf32>
    %42 = vector.broadcast %41 : vector<1x256xf32> to vector<8x256xf32>
    %43 = arith.addf %40, %42 : vector<8x256xf32>
    %cst_36 = arith.constant 0.000000e+00 : f32
    %44 = vector.broadcast %cst_36 : f32 to vector<8x256xf32>
    %45 = arith.maximumf %43, %44 : vector<8x256xf32>
    %c0_37 = arith.constant 0 : index
    %c0_38 = arith.constant 0 : index
    %46 = vector.load %arg13[%c0_37, %c0_38] : memref<256x64xf32, #tpu.memory_space<vmem>>, vector<256x64xf32>
    %cst_39 = arith.constant dense<0.000000e+00> : vector<8x64xf32>
    %47 = tpu.matmul %45, %46, %cst_39 {dimension_numbers = #tpu.dot_dimension_numbers<[1], [0], [0], [1], [0, 0, 1, 1], [], []>} : vector<8x256xf32>, vector<256x64xf32>, vector<8x64xf32> -> vector<8x64xf32>
    %c0_40 = arith.constant 0 : index
    %c0_41 = arith.constant 0 : index
    %48 = vector.load %arg14[%c0_40, %c0_41] : memref<1x64xf32, #tpu.memory_space<vmem>>, vector<1x64xf32>
    %49 = vector.broadcast %48 : vector<1x64xf32> to vector<8x64xf32>
    %50 = arith.addf %47, %49 : vector<8x64xf32>
    %51 = arith.mulf %37, %37 : vector<8x64xf32>
    %cst_42 = arith.constant dense<0.000000e+00> : vector<8xf32>
    %52 = vector.multi_reduction <add>, %51, %cst_42 [1] : vector<8x64xf32> to vector<8xf32>
    %53 = vector.shape_cast %52 : vector<8xf32> to vector<8x1xf32>
    %54 = math.rsqrt %53 : vector<8x1xf32>
    %55 = vector.broadcast %54 : vector<8x1xf32> to vector<8x64xf32>
    %56 = arith.mulf %37, %55 : vector<8x64xf32>
    %57 = arith.mulf %50, %50 : vector<8x64xf32>
    %cst_43 = arith.constant dense<0.000000e+00> : vector<8xf32>
    %58 = vector.multi_reduction <add>, %57, %cst_43 [1] : vector<8x64xf32> to vector<8xf32>
    %59 = vector.shape_cast %58 : vector<8xf32> to vector<8x1xf32>
    %60 = math.rsqrt %59 : vector<8x1xf32>
    %61 = vector.broadcast %60 : vector<8x1xf32> to vector<8x64xf32>
    %62 = arith.mulf %50, %61 : vector<8x64xf32>
    %c0_44 = arith.constant 0 : index
    %63 = memref.load %arg15[%c0_44] : memref<1xf32, #tpu.memory_space<smem>>
    %64 = vector.broadcast %63 : f32 to vector<8x64xf32>
    %65 = arith.mulf %56, %64 : vector<8x64xf32>
    %cst_45 = arith.constant dense<0.000000e+00> : vector<8x8xf32>
    %66 = tpu.matmul %65, %62, %cst_45 {dimension_numbers = #tpu.dot_dimension_numbers<[1], [1], [0], [0], [0, 0, 1, 0], [], []>} : vector<8x64xf32>, vector<8x64xf32>, vector<8x8xf32> -> vector<8x8xf32>
    %c0_46 = arith.constant 0 : index
    %c0_47 = arith.constant 0 : index
    %67 = vector.load %arg16[%c0_46, %c0_47] : memref<8x8xf32, #tpu.memory_space<vmem>>, vector<8x8xf32>
    tpu.vector_store %arg16[%c0_46, %c0_47], %66 {strides = array<i32>} : memref<8x8xf32, #tpu.memory_space<vmem>>, vector<8x8xf32>,
    return
  }
  func.func @transform_0(%arg0: i32) -> (i32, i32) {
    %c0_i32 = arith.constant 0 : i32
    %c0_i32_0 = arith.constant 0 : i32
    %c0_i32_1 = arith.constant 0 : i32
    return %c0_i32, %c0_i32_0 : i32, i32
  }
  func.func @transform_1(%arg0: i32) -> (i32, i32) {
    %c0_i32 = arith.constant 0 : i32
    %c0_i32_0 = arith.constant 0 : i32
    %c0_i32_1 = arith.constant 0 : i32
    return %c0_i32, %c0_i32_0 : i32, i32
  }
  func.func @transform_2(%arg0: i32) -> (i32, i32) {
    %c0_i32 = arith.constant 0 : i32
    %c0_i32_0 = arith.constant 0 : i32
    %c0_i32_1 = arith.constant 0 : i32
    return %c0_i32, %c0_i32_0 : i32, i32
  }
  func.func @transform_3(%arg0: i32) -> (i32, i32) {
    %c0_i32 = arith.constant 0 : i32
    %c0_i32_0 = arith.constant 0 : i32
    %c0_i32_1 = arith.constant 0 : i32
    return %c0_i32, %c0_i32_0 : i32, i32
  }
  func.func @transform_4(%arg0: i32) -> (i32, i32) {
    %c0_i32 = arith.constant 0 : i32
    %c0_i32_0 = arith.constant 0 : i32
    %c0_i32_1 = arith.constant 0 : i32
    return %c0_i32, %c0_i32_0 : i32, i32
  }
  func.func @transform_5(%arg0: i32) -> (i32, i32) {
    %c0_i32 = arith.constant 0 : i32
    %c0_i32_0 = arith.constant 0 : i32
    %c0_i32_1 = arith.constant 0 : i32
    return %c0_i32, %c0_i32_0 : i32, i32
  }
  func.func @transform_6(%arg0: i32) -> (i32, i32) {
    %c0_i32 = arith.constant 0 : i32
    %c0_i32_0 = arith.constant 0 : i32
    %c0_i32_1 = arith.constant 0 : i32
    return %c0_i32, %c0_i32_0 : i32, i32
  }
  func.func @transform_7(%arg0: i32) -> (i32, i32) {
    %c0_i32 = arith.constant 0 : i32
    %c0_i32_0 = arith.constant 0 : i32
    %c0_i32_1 = arith.constant 0 : i32
    return %c0_i32, %c0_i32_0 : i32, i32
  }
  func.func @transform_8(%arg0: i32) -> (i32, i32) {
    %c0_i32 = arith.constant 0 : i32
    %c0_i32_0 = arith.constant 0 : i32
    %c0_i32_1 = arith.constant 0 : i32
    return %c0_i32, %c0_i32_0 : i32, i32
  }
  func.func @transform_9(%arg0: i32) -> (i32, i32) {
    %c0_i32 = arith.constant 0 : i32
    %c0_i32_0 = arith.constant 0 : i32
    %c0_i32_1 = arith.constant 0 : i32
    return %c0_i32, %c0_i32_0 : i32, i32
  }
  func.func @transform_10(%arg0: i32) -> (i32, i32) {
    %c0_i32 = arith.constant 0 : i32
    %c0_i32_0 = arith.constant 0 : i32
    %c0_i32_1 = arith.constant 0 : i32
    return %c0_i32, %c0_i32_0 : i32, i32
  }
  func.func @transform_11(%arg0: i32) -> (i32, i32) {
    %c0_i32 = arith.constant 0 : i32
    %c0_i32_0 = arith.constant 0 : i32
    %c0_i32_1 = arith.constant 0 : i32
    return %c0_i32, %c0_i32_0 : i32, i32
  }
  func.func @transform_12(%arg0: i32) -> (i32, i32) {
    %c0_i32 = arith.constant 0 : i32
    %c0_i32_0 = arith.constant 0 : i32
    %c0_i32_1 = arith.constant 0 : i32
    return %c0_i32, %c0_i32_0 : i32, i32
  }
  func.func @transform_13(%arg0: i32) -> (i32, i32) {
    %c0_i32 = arith.constant 0 : i32
    %c0_i32_0 = arith.constant 0 : i32
    %c0_i32_1 = arith.constant 0 : i32
    return %c0_i32, %c0_i32_0 : i32, i32
  }
  func.func @transform_14(%arg0: i32) -> i32 {
    %c0_i32 = arith.constant 0 : i32
    %c0_i32_0 = arith.constant 0 : i32
    return %c0_i32 : i32
  }
  func.func @transform_15(%arg0: i32) -> (i32, i32) {
    %c0_i32 = arith.constant 0 : i32
    %c0_i32_0 = arith.constant 0 : i32
    %c0_i32_1 = arith.constant 0 : i32
    return %c0_i32, %c0_i32_0 : i32, i32
  }
}

</mosaic_0001>

<bundles_post_ra>
// kernel: tpu_custom_call.1
= control target key start
LH: loop header
LB: loop body
LE: loop exit
PB: predicated region body
PF: predicated region fallthrough
CT: control target
= control target key end

     0   :  { %21 = vsyncpa [#allocation4], 0  ;;  %s1671_s0 = inlined_call_operand.vmem [shape: f32[8,8], index: 0, kind: input, shape index: {}]   ;;  %s1672_s1 = inlined_call_operand.vmem [shape: f32[8,32], index: 1, kind: input, shape index: {}]   ;;  %s1673_s2 = inlined_call_operand.vmem [shape: f32[8,32], index: 2, kind: input, shape index: {}]   ;;  %s1674_s3 = inlined_call_operand.vmem [shape: f32[8,512], index: 3, kind: input, shape index: {}]   ;;  %s1675_s4 = inlined_call_operand.vmem [shape: f32[32,32], index: 4, kind: input, shape index: {}]   ;;  %s1676_s5 = inlined_call_operand.vmem [shape: f32[1,32], index: 5, kind: input, shape index: {}]   ;;  %s1677_s6 = inlined_call_operand.vmem [shape: f32[32,32], index: 6, kind: input, shape index: {}]   ;;  %s1678_s7 = inlined_call_operand.vmem [shape: f32[1,32], index: 7, kind: input, shape index: {}]   ;;  %s1679_s8 = inlined_call_operand.vmem [shape: f32[32,64], index: 8, kind: input, shape index: {}]   ;;  %s1680_s9 = inlined_call_operand.vmem [shape: f32[1,64], index: 9, kind: input, shape index: {}]   ;;  %s1681_s10 = inlined_call_operand.hbm [shape: f32[512,256], index: 10, kind: input, shape index: {}]   ;;  %s1682_s11 = inlined_call_operand.vmem [shape: f32[1,256], index: 11, kind: input, shape index: {}]   ;;  %s1683_s12 = inlined_call_operand.vmem [shape: f32[256,64], index: 12, kind: input, shape index: {}]   ;;  %s1684_s13 = inlined_call_operand.vmem [shape: f32[1,64], index: 13, kind: input, shape index: {}]   ;;  %s1685_s14 = inlined_call_operand.<no memory space> [shape: f32[1], index: 14, kind: input, shape index: {}]   ;;  %s1686_s15 = inlined_call_operand.hbm [shape: f32[8,8], index: 15, kind: output, shape index: {}]  }
   0x1   :  { %22 = vsyncpa [#allocation5], 0  ;;  %s1354_s18 = smov [#allocation3]   ;;  %s1306_s22 = scalar_lea.hbm %s1681_s10, 16384 }
   0x2   :  { %s48_s19 = sshll.u32 %s1354_s18, 4  ;;  %p1307_p0 = scmp.ne.s32.totalorder %s1681_s10, %s1306_s22  ;;  %s49_s19 = int_to_ptr.vmem [resolvable:$true] %s48_s19 }
   0x3   :  { %p1310_p1 = scmp.lt.u32.totalorder %s1306_s22, %s1681_s10 }
   0x5   :  { %p1312_p2 = pnand %p1310_p1, %p1307_p0 }
   0x7   :  { %1315 = shalt.err (!%p1312_p2)
}
   0x8   :  { %s1316_s27 = scalar_lea.vmem %s49_s19, 16384  ;;  %p1321_p4 = scmp.lt.s32.totalorder %s49_s19, %s49_s19 }
   0x9   :  { %p1317_p3 = scmp.ne.s32.totalorder %s49_s19, %s1316_s27  ;;  %p1322_p5 = scmp.lt.s32.totalorder %s1316_s27, %s1316_s27 }
   0xb   :  { %p1323_p6 = por %p1322_p5, %p1321_p4 }
   0xd   :  { %p1324_p7 = pnand %p1323_p6, %p1317_p3 }
   0xf   :  { %1327 = shalt.err (!%p1324_p7)
}
  0x10   :  { %s1355_s28 = smov 256   ;;  %s1356_s29 = smov 16  }
  0x11   :  { %54 = dma.hbm_to_vmem [thread:$0]  %s1681_s10, 16384, %s49_s19, [#allocation4], %s1355_s28, %s1355_s28, %s1356_s29  }
  0x12   :  { %1350 = dma.done.wait [#allocation4], 16384  }
  0x13   :  { %1351 = vsyncadd [#allocation4], 4294950912  ;;  %v1357_v0 = vmov 0.0|0.0   ;;  %vm1358_vm0 = vmmov 0   ;;  %v1359_v1 = vmov 0.0   ;;  %v67_v2 = vld [vmem:[%s1675_s4] sm:$0xff] }
  0x14   :  { %1108 = vmatprep.subr.bf16.mxu0 %v1357_v0  ;;  %1068 = vmatprep.mubr.msk.f32.mxu0 %vm1358_vm0, %v1359_v1  ;;  %v68_v3 = vld [vmem:[%s1675_s4 + $0x8] sm:$0xff]  ;;  %v69_v4 = vld [vmem:[%s1675_s4 + $0x10] sm:$0xff]  ;;  %v70_v6 = vld [vmem:[%s1675_s4 + $0x18] sm:$0xff]  ;;  %vm78_vm1 = vcmask 261120   ;;  %vm1360_vm3 = vmmov 1   ;;  %vm318_vm5 = vcmask 64512  }
  0x15   :  { %1087 = vmatprep.subr.mxu1 %v1359_v1  ;;  %1089 = vmatprep.mubr.msk.f32.mxu1 %vm1358_vm0, %v1359_v1  ;;  %v1109_v5 = vpack.c.bf16 %v68_v3, %v67_v2  ;;  %v1112_v7 = vpack.c.bf16 %v70_v6, %v69_v4  ;;  %v152_v8 = vld [vmem:[%s1673_s2] sm:$0xff]  ;;  %v154_v10 = vld [vmem:[%s1677_s6 + $0x8] sm:$0xff]  ;;  %v155_v13 = vld [vmem:[%s1677_s6 + $0x10] sm:$0xff]  ;;  %vm885_vm6 = vcmask 523264   ;;  %s1361_s27 = smov [#allocation6]  }
  0x16   :  { %v153_v9 = vld [vmem:[%s1677_s6] sm:$0xff]  ;;  %1088 = vmatpush3.msra.mxu1 %v152_v8  ;;  %v156_v14 = vld [vmem:[%s1677_s6 + $0x18] sm:$0xff]  ;;  %v404_v36 = vld [vmem:[%s1679_s8 + $0x8] sm:$0xff]  ;;  %s983_s28 = sshll.u32 %s1361_s27, 4  ;;  %s984_s28 = int_to_ptr.vmem [resolvable:$true] %s983_s28 }
  0x17   :  { %1110 = vmatpush3.bf16.msra.mxu0 %v1109_v5  ;;  %v66_v11 = vld [vmem:[%s1672_s1] sm:$0xff]  ;;  %v1115_v12 = vpack.c.bf16 %v154_v10, %v153_v9  ;;  %v1118_v15 = vpack.c.bf16 %v156_v14, %v155_v13  ;;  %v405_v37 = vld [vmem:[%s1679_s8 + $0x10] sm:$0xff]  ;;  %v406_v39 = vld [vmem:[%s1679_s8 + $0x18] sm:$0xff]  ;;  %s1328_s29 = scalar_lea.vmem %s984_s28, 128  ;;  %p1333_p9 = scmp.lt.s32.totalorder %s984_s28, %s984_s28 }
  0x18   :  { %1111 = vmatprep.subr.bf16.mxu0 %v1357_v0  ;;  %v992_v18 = vld [vmem:[%s1676_s5] ss:$0 sm:$0xff]  ;;  %v1124_v40 = vpack.c.bf16 %v406_v39, %v405_v37  ;;  %v492_v44 = vld [vmem:[#allocation3 + $0x8] sm:$0xff]  ;;  %v494_v45 = vld [vmem:[#allocation3 + $0x18] sm:$0xff]  ;;  %p1329_p8 = scmp.ne.s32.totalorder %s984_s28, %s1328_s29  ;;  %p1334_p10 = scmp.lt.s32.totalorder %s1328_s29, %s1328_s29 }
  0x19   :  { %v994_v19 = vld [vmem:[%s1678_s7] ss:$0 sm:$0xff]  ;;  %v1126_v46 = vpack.c.bf16 %v494_v45, %v492_v44  ;;  %v556_v47 = vld [vmem:[#allocation3 + $0x208] sm:$0xff]  ;;  %v558_v48 = vld [vmem:[#allocation3 + $0x218] sm:$0xff] }
  0x1a   :  { %v314_v25 = vld [vmem:[%s1671_s0] sm:$0xff]  ;;  %v1190_v49 = vpack.c.bf16 %v558_v48, %v556_v47  ;;  %v557_v51 = vld [vmem:[#allocation3 + $0x210] sm:$0xff]  ;;  %v560_v53 = vld [vmem:[#allocation3 + $0x228] sm:$0xff]  ;;  %p1335_p11 = por %p1334_p10, %p1333_p9 }
  0x1b   :  { %1113 = vmatpush3.bf16.msra.mxu0 %v1112_v7  ;;  %vm315_vm2 = vcmp.gt.f32.partialorder %v314_v25, 0.0  ;;  %v403_v35 = vld [vmem:[%s1679_s8] sm:$0xff]  ;;  %v562_v54 = vld [vmem:[#allocation3 + $0x238] sm:$0xff]  ;;  %v561_v56 = vld [vmem:[#allocation3 + $0x230] sm:$0xff] }
  0x1c   :  { %1114 = vmatprep.subr.bf16.mxu0 %v1357_v0  ;;  %vm316_vm4 = vmxor %vm315_vm2, %vm1360_vm3  ;;  %v1121_v38 = vpack.c.bf16 %v404_v36, %v403_v35  ;;  %v555_v50 = vld [vmem:[#allocation3 + $0x200] sm:$0xff]  ;;  %1191 = vmatprep.subr.bf16.mxu1 %v1190_v49  ;;  %v1194_v57 = vpack.c.bf16 %v562_v54, %v560_v53  ;;  %v564_v59 = vld [vmem:[#allocation3 + $0x248] sm:$0xff]  ;;  %p1336_p12 = pnand %p1335_p11, %p1329_p8 }
  0x1d   :  { %v1192_v52 = vpack.c.bf16 %v557_v51, %v555_v50  ;;  %v559_v55 = vld [vmem:[#allocation3 + $0x220] sm:$0xff]  ;;  %v566_v60 = vld [vmem:[#allocation3 + $0x258] sm:$0xff]  ;;  %v565_v62 = vld [vmem:[#allocation3 + $0x250] sm:$0xff] }
  0x1e   :  { %1069 = vmatmul.mubr.msk.f32.vlgmr.msra.gmra.mrb[0].mxu0 %vm78_vm1, %v66_v11  ;;  %v1196_v58 = vpack.c.bf16 %v561_v56, %v559_v55  ;;  %v563_v61 = vld [vmem:[#allocation3 + $0x240] sm:$0xff]  ;;  %v1198_v63 = vpack.c.bf16 %v566_v60, %v564_v59  ;;  %v568_v2 = vld [vmem:[#allocation3 + $0x268] sm:$0xff]  ;;  %v570_v3 = vld [vmem:[#allocation3 + $0x278] sm:$0xff] }
  0x1f   :  { %1116 = vmatpush3.bf16.msra.mxu0 %v1115_v12  ;;  %1079 = vmatprep.mubr.msk.f32.mxu0 %vm1358_vm0, %v1359_v1  ;;  %v567_v4 = vld [vmem:[#allocation3 + $0x260] sm:$0xff]  ;;  %v569_v5 = vld [vmem:[#allocation3 + $0x270] sm:$0xff]  ;;  %v1202_v6 = vpack.c.bf16 %v570_v3, %v568_v2  ;;  %v574_v9 = vld [vmem:[#allocation3 + $0x298] sm:$0xff] }
  0x20   :  { %1117 = vmatprep.subr.bf16.mxu0 %v1357_v0  ;;  %v1204_v7 = vpack.c.bf16 %v569_v5, %v567_v4  ;;  %v571_v10 = vld [vmem:[#allocation3 + $0x280] sm:$0xff]  ;;  %v573_v11 = vld [vmem:[#allocation3 + $0x290] sm:$0xff]  ;;  %v576_v14 = vld [vmem:[#allocation3 + $0x2a8] sm:$0xff] }
  0x21   :  { %v1208_v13 = vpack.c.bf16 %v573_v11, %v571_v10  ;;  %v589_v35 = vld [vmem:[#allocation3 + $0x310] sm:$0xff]  ;;  %v594_v39 = vld [vmem:[#allocation3 + $0x338] sm:$0xff]  ;;  %v596_v44 = vld [vmem:[#allocation3 + $0x348] sm:$0xff] }
  0x22   :  { %v598_v45 = vld [vmem:[#allocation3 + $0x358] sm:$0xff]  ;;  %v597_v47 = vld [vmem:[#allocation3 + $0x350] sm:$0xff]  ;;  %v600_v50 = vld [vmem:[#allocation3 + $0x368] sm:$0xff] }
  0x23   :  { %1119 = vmatpush3.bf16.msra.mxu0 %v1118_v15  ;;  %v578_v15 = vld [vmem:[#allocation3 + $0x2b8] sm:$0xff]  ;;  %v1230_v48 = vpack.c.bf16 %v598_v45, %v596_v44  ;;  %v601_v53 = vld [vmem:[#allocation3 + $0x370] sm:$0xff]  ;;  %v604_v56 = vld [vmem:[#allocation3 + $0x388] sm:$0xff] }
  0x24   :  { %1082 = vmatprep.subr.mxu0 %v1359_v1  ;;  %v602_v51 = vld [vmem:[#allocation3 + $0x378] sm:$0xff]  ;;  %v605_v59 = vld [vmem:[#allocation3 + $0x390] sm:$0xff]  ;;  %v612_v5 = vld [vmem:[#allocation3 + $0x3c8] sm:$0xff] }
  0x25   :  { %v1234_v54 = vpack.c.bf16 %v602_v51, %v600_v50  ;;  %v609_v2 = vld [vmem:[#allocation3 + $0x3b0] sm:$0xff]  ;;  %v616_v11 = vld [vmem:[#allocation3 + $0x3e8] sm:$0xff] }
  0x26   :  { %1080 = vmatmul.mubr.msk.f32.vlgmr.msra.gmra.mrb[2].mxu0 %vm78_vm1, %v152_v8  ;;  %v572_v8 = vld [vmem:[#allocation3 + $0x288] sm:$0xff] }
  0x27   :  { %1084 = vmatprep.mubr.msk.f32.mxu0 %vm1358_vm0, %v1359_v1  ;;  %v1206_v12 = vpack.c.bf16 %v574_v9, %v572_v8  ;;  %v613_v8 = vld [vmem:[#allocation3 + $0x3d0] sm:$0xff] }
  0xf1   :  { %v148_v16 = vpop.f32.mrb[0].mxu0 }
  0xf2   :  { %v1070_v17 = vpop.f32.mrb[1].mxu0  ;;  %v149_v20 = vadd.f32 %v992_v18, %v148_v16  ;;  %v575_v16 = vld [vmem:[#allocation3 + $0x2a0] sm:$0xff]  ;;  %v1210_v18 = vpack.c.bf16 %v578_v15, %v576_v14  ;;  %v617_v14 = vld [vmem:[#allocation3 + $0x3f0] sm:$0xff] }
  0xf3   :  { %v577_v17 = vld [vmem:[#allocation3 + $0x2b0] sm:$0xff] }
  0xf4   :  { %v237_v24 = vmul.f32 0.17677669, %v149_v20  ;;  %v580_v20 = vld [vmem:[#allocation3 + $0x2c8] sm:$0xff] }
  0xf9   :  { %v233_v21 = vpop.f32.mrb[2].mxu0 }
  0xfa   :  { %v234_v22 = vadd.f32 %v994_v19, %v233_v21  ;;  %v1081_v23 = vpop.f32.mrb[3].mxu0  ;;  %v1212_v19 = vpack.c.bf16 %v577_v17, %v575_v16  ;;  %v582_v21 = vld [vmem:[#allocation3 + $0x2d8] sm:$0xff] }
  0xfb   :  { %v581_v23 = vld [vmem:[#allocation3 + $0x2d0] sm:$0xff]  ;;  %v490_v17 = vld [vmem:[%s1674_s3 + $0x18] sm:$0xff] }
  0xfc   :  { %1083 = vmatpush3.xpose.msk.msra.mxu0 %vm78_vm1, %v234_v22  ;;  %v579_v22 = vld [vmem:[#allocation3 + $0x2c0] sm:$0xff] }
  0xfd   :  { %1120 = vmatprep.subr.bf16.mxu0 %v1357_v0  ;;  %v1216_v25 = vpack.c.bf16 %v581_v23, %v579_v22  ;;  %v498_v22 = vld [vmem:[#allocation3 + $0x38] sm:$0xff] }
  0xff   :  { %1085 = vmatmul.mubr.msk.f32.vlgmr.msra.gmra.mrb[4].mxu0 %vm78_vm1, %v237_v24  ;;  %v1214_v24 = vpack.c.bf16 %v582_v21, %v580_v20  ;;  %v493_v20 = vld [vmem:[#allocation3 + $0x10] sm:$0xff]  ;;  %v496_v21 = vld [vmem:[#allocation3 + $0x28] sm:$0xff] }
 0x100   :  { %1100 = vmatprep.mubr.msk.f32.mxu0 %vm1358_vm0, %v1359_v1  ;;  %1122 = vmatpush3.bf16.msra.mxu0 %v1121_v38  ;;  %v592_v38 = vld [vmem:[#allocation3 + $0x328] sm:$0xff] }
 0x101   :  { %1123 = vmatprep.subr.bf16.mxu0 %v1357_v0  ;;  %v1200_v0 = vpack.c.bf16 %v565_v62, %v563_v61  ;;  %v608_v62 = vld [vmem:[#allocation3 + $0x3a8] sm:$0xff] }
 0x104   :  { %1125 = vmatpush3.bf16.msra.mxu0 %v1124_v40  ;;  %v591_v40 = vld [vmem:[#allocation3 + $0x320] sm:$0xff] }
 0x105   :  { %1127 = vmatprep.subr.bf16.mxu0 %v1126_v46  ;;  %v595_v46 = vld [vmem:[#allocation3 + $0x340] sm:$0xff] }
 0x106   :  { %v1232_v49 = vpack.c.bf16 %v597_v47, %v595_v46  ;;  %v507_v46 = vld [vmem:[#allocation3 + $0x80] sm:$0xff]  ;;  %v509_v47 = vld [vmem:[#allocation3 + $0x90] sm:$0xff] }
 0x107   :  { %v1144_v50 = vpack.c.bf16 %v509_v47, %v507_v46  ;;  %v554_v46 = vld [vmem:[#allocation3 + $0x1f8] sm:$0xff] }
 0x1d2   :  { %v310_v26 = vpop.f32.mrb[4].mxu0 }
 0x1d3   :  { %v317_v27 = vsel %vm316_vm4, -4.2949673e+09, %v310_v26  ;;  %v1086_v28 = vpop.f32.mrb[5].mxu0  ;;  %v584_v26 = vld [vmem:[#allocation3 + $0x2e8] sm:$0xff] }
 0x1d4   :  { %v319_v29 = vsel %vm318_vm5, %v317_v27, -inf  ;;  %v583_v28 = vld [vmem:[#allocation3 + $0x2e0] sm:$0xff] }
 0x1d5   :  { %320 = vmax.xlane.f32.xlu0 %v319_v29  ;;  %v585_v29 = vld [vmem:[#allocation3 + $0x2f0] sm:$0xff] }
 0x262   :  { %v321_v30 = vpop.xlane.xlu0 %320 }
 0x263   :  { %v322_v31 = vsub.f32 %v317_v27, %v321_v30  ;;  %v586_v27 = vld [vmem:[#allocation3 + $0x2f8] sm:$0xff] }
 0x264   :  { %v1218_v30 = vpack.c.bf16 %v586_v27, %v584_v26  ;;  %v497_v26 = vld [vmem:[#allocation3 + $0x30] sm:$0xff]  ;;  %v488_v27 = vld [vmem:[%s1674_s3 + $0x8] sm:$0xff] }
 0x265   :  { %v323_v32 = vmul.f32 1.442695, %v322_v31  ;;  %v1220_v31 = vpack.c.bf16 %v585_v29, %v583_v28  ;;  %v500_v29 = vld [vmem:[#allocation3 + $0x48] sm:$0xff] }
 0x267   :  { %1298 = vpow2.f32 %v323_v32  ;;  %v588_v32 = vld [vmem:[#allocation3 + $0x308] sm:$0xff] }
 0x271   :  { %v1299_v33 = vpop.eup %1298 }
 0x272   :  { %v325_v34 = vsel %vm318_vm5, %v1299_v33, 0.0 }
 0x273   :  { %326 = vadd.xlane.f32.xlu0 %v325_v34  ;;  %v587_v34 = vld [vmem:[#allocation3 + $0x300] sm:$0xff] }
 0x274   :  { %v1224_v37 = vpack.c.bf16 %v589_v35, %v587_v34  ;;  %v499_v34 = vld [vmem:[#allocation3 + $0x40] sm:$0xff]  ;;  %v501_v35 = vld [vmem:[#allocation3 + $0x50] sm:$0xff] }
 0x300   :  { %v327_v41 = vpop.xlane.xlu0 %326 }
 0x301   :  { %1300 = vrcp.f32 %v327_v41  ;;  %v593_v41 = vld [vmem:[#allocation3 + $0x330] sm:$0xff] }
 0x30b   :  { %v1301_v42 = vpop.eup %1300 }
 0x30c   :  { %v329_v43 = vmul.f32 %v1301_v42, %v1299_v33  ;;  %v590_v33 = vld [vmem:[#allocation3 + $0x318] sm:$0xff]  ;;  %v1226_v42 = vpack.c.bf16 %v594_v39, %v592_v38  ;;  %v1136_v38 = vpack.c.bf16 %v501_v35, %v499_v34 }
 0x30d   :  { %v1222_v36 = vpack.c.bf16 %v590_v33, %v588_v32  ;;  %v546_v34 = vld [vmem:[#allocation3 + $0x1b8] sm:$0xff] }
 0x30e   :  { %1090 = vmatmul.mubr.msk.f32.vlgmr.msra.gmra.mrb[0].mxu1 %vm318_vm5, %v329_v43  ;;  %v1228_v43 = vpack.c.bf16 %v593_v41, %v591_v40  ;;  %v503_v40 = vld [vmem:[#allocation3 + $0x60] sm:$0xff]  ;;  %v505_v41 = vld [vmem:[#allocation3 + $0x70] sm:$0xff] }
 0x30f   :  { %1193 = vmatpush1.bf16.msra.mxu1 %v1192_v52  ;;  %v599_v52 = vld [vmem:[#allocation3 + $0x360] sm:$0xff]  ;;  %766 = vmatprep.mubr.f32.mxu1 %v490_v17  ;;  %v1140_v44 = vpack.c.bf16 %v505_v41, %v503_v40  ;;  %v550_v40 = vld [vmem:[#allocation3 + $0x1d8] sm:$0xff] }
 0x310   :  { %1195 = vmatprep.subr.bf16.mxu1 %v1194_v57  ;;  %v1236_v55 = vpack.c.bf16 %v601_v53, %v599_v52  ;;  %v606_v57 = vld [vmem:[#allocation3 + $0x398] sm:$0xff]  ;;  %v511_v52 = vld [vmem:[#allocation3 + $0xa0] sm:$0xff]  ;;  %v513_v53 = vld [vmem:[#allocation3 + $0xb0] sm:$0xff] }
 0x311   :  { %v1238_v60 = vpack.c.bf16 %v606_v57, %v604_v56  ;;  %v1148_v56 = vpack.c.bf16 %v513_v53, %v511_v52  ;;  %v487_v52 = vld [vmem:[%s1674_s3] sm:$0xff] }
 0x312   :  { %v791_v53 = vld [vmem:[%s1683_s12 + $0x80] sm:$0xff] }
 0x313   :  { %1197 = vmatpush1.bf16.msra.mxu1 %v1196_v58  ;;  %v603_v58 = vld [vmem:[#allocation3 + $0x380] sm:$0xff] }
 0x314   :  { %1199 = vmatprep.subr.bf16.mxu1 %v1198_v63  ;;  %v1240_v61 = vpack.c.bf16 %v605_v59, %v603_v58  ;;  %v610_v63 = vld [vmem:[#allocation3 + $0x3b8] sm:$0xff]  ;;  %v515_v58 = vld [vmem:[#allocation3 + $0xc0] sm:$0xff]  ;;  %v517_v59 = vld [vmem:[#allocation3 + $0xd0] sm:$0xff] }
 0x315   :  { %v1242_v3 = vpack.c.bf16 %v610_v63, %v608_v62  ;;  %v1152_v62 = vpack.c.bf16 %v517_v59, %v515_v58  ;;  %v794_v58 = vld [vmem:[%s1683_s12 + $0x98] sm:$0xff] }
 0x317   :  { %1201 = vmatpush1.bf16.msra.mxu1 %v1200_v0  ;;  %v607_v0 = vld [vmem:[#allocation3 + $0x3a0] sm:$0xff] }
 0x318   :  { %1203 = vmatprep.subr.bf16.mxu1 %v1202_v6  ;;  %v1244_v4 = vpack.c.bf16 %v609_v2, %v607_v0  ;;  %v614_v6 = vld [vmem:[#allocation3 + $0x3d8] sm:$0xff]  ;;  %v519_v0 = vld [vmem:[#allocation3 + $0xe0] sm:$0xff]  ;;  %v521_v2 = vld [vmem:[#allocation3 + $0xf0] sm:$0xff] }
 0x319   :  { %v1246_v9 = vpack.c.bf16 %v614_v6, %v612_v5  ;;  %v1156_v5 = vpack.c.bf16 %v521_v2, %v519_v0  ;;  %v796_v0 = vld [vmem:[%s1683_s12 + $0xa8] sm:$0xff] }
 0x31b   :  { %1205 = vmatpush1.bf16.msra.mxu1 %v1204_v7  ;;  %v611_v7 = vld [vmem:[#allocation3 + $0x3c0] sm:$0xff] }
 0x31c   :  { %1207 = vmatprep.subr.bf16.mxu1 %v1206_v12  ;;  %v1248_v10 = vpack.c.bf16 %v613_v8, %v611_v7  ;;  %v618_v12 = vld [vmem:[#allocation3 + $0x3f8] sm:$0xff]  ;;  %v523_v7 = vld [vmem:[#allocation3 + $0x100] sm:$0xff]  ;;  %v525_v8 = vld [vmem:[#allocation3 + $0x110] sm:$0xff] }
 0x31d   :  { %v1250_v15 = vpack.c.bf16 %v618_v12, %v616_v11  ;;  %v1160_v11 = vpack.c.bf16 %v525_v8, %v523_v7  ;;  %v798_v7 = vld [vmem:[%s1683_s12 + $0xb8] sm:$0xff] }
 0x31f   :  { %1209 = vmatpush1.bf16.msra.mxu1 %v1208_v13  ;;  %v615_v13 = vld [vmem:[#allocation3 + $0x3e0] sm:$0xff] }
 0x320   :  { %1211 = vmatprep.subr.bf16.mxu1 %v1210_v18  ;;  %v1252_v16 = vpack.c.bf16 %v617_v14, %v615_v13  ;;  %v489_v18 = vld [vmem:[%s1674_s3 + $0x10] sm:$0xff]  ;;  %v527_v13 = vld [vmem:[#allocation3 + $0x120] sm:$0xff] }
 0x321   :  { %v529_v14 = vld [vmem:[#allocation3 + $0x130] sm:$0xff] }
 0x322   :  { %v1164_v17 = vpack.c.bf16 %v529_v14, %v527_v13  ;;  %v800_v13 = vld [vmem:[%s1683_s12 + $0xc8] sm:$0xff] }
 0x323   :  { %1213 = vmatpush1.bf16.msra.mxu1 %v1212_v19  ;;  %v491_v19 = vld [vmem:[#allocation3] sm:$0xff] }
 0x324   :  { %1215 = vmatprep.subr.bf16.mxu1 %v1214_v24  ;;  %v1128_v23 = vpack.c.bf16 %v493_v20, %v491_v19  ;;  %v1130_v24 = vpack.c.bf16 %v498_v22, %v496_v21  ;;  %v531_v19 = vld [vmem:[#allocation3 + $0x140] sm:$0xff]  ;;  %v533_v20 = vld [vmem:[#allocation3 + $0x150] sm:$0xff]  ;;  %v536_v21 = vld [vmem:[#allocation3 + $0x168] sm:$0xff] }
 0x325   :  { %v538_v22 = vld [vmem:[#allocation3 + $0x178] sm:$0xff] }
 0x327   :  { %1217 = vmatpush1.bf16.msra.mxu1 %v1216_v25  ;;  %v495_v25 = vld [vmem:[#allocation3 + $0x20] sm:$0xff] }
 0x328   :  { %1219 = vmatprep.subr.bf16.mxu1 %v1218_v30  ;;  %v502_v30 = vld [vmem:[#allocation3 + $0x58] sm:$0xff]  ;;  %v1132_v32 = vpack.c.bf16 %v497_v26, %v495_v25  ;;  %v535_v25 = vld [vmem:[#allocation3 + $0x160] sm:$0xff]  ;;  %v537_v26 = vld [vmem:[#allocation3 + $0x170] sm:$0xff] }
 0x329   :  { %v1134_v33 = vpack.c.bf16 %v502_v30, %v500_v29  ;;  %v1172_v29 = vpack.c.bf16 %v537_v26, %v535_v25  ;;  %v803_v25 = vld [vmem:[%s1683_s12 + $0xe0] sm:$0xff]  ;;  %v804_v26 = vld [vmem:[%s1683_s12 + $0xe8] sm:$0xff] }
 0x32b   :  { %1221 = vmatpush1.bf16.msra.mxu1 %v1220_v31 }
 0x32c   :  { %1223 = vmatprep.subr.bf16.mxu1 %v1222_v36  ;;  %v504_v36 = vld [vmem:[#allocation3 + $0x68] sm:$0xff] }
 0x32f   :  { %1225 = vmatpush1.bf16.msra.mxu1 %v1224_v37  ;;  %v506_v37 = vld [vmem:[#allocation3 + $0x78] sm:$0xff] }
 0x330   :  { %1227 = vmatprep.subr.bf16.mxu1 %v1226_v42  ;;  %v1138_v39 = vpack.c.bf16 %v506_v37, %v504_v36  ;;  %v508_v42 = vld [vmem:[#allocation3 + $0x88] sm:$0xff]  ;;  %v543_v37 = vld [vmem:[#allocation3 + $0x1a0] sm:$0xff] }
 0x333   :  { %1229 = vmatpush1.bf16.msra.mxu1 %v1228_v43  ;;  %v510_v43 = vld [vmem:[#allocation3 + $0x98] sm:$0xff] }
 0x334   :  { %1231 = vmatprep.subr.bf16.mxu1 %v1230_v48  ;;  %v1142_v45 = vpack.c.bf16 %v510_v43, %v508_v42  ;;  %v512_v48 = vld [vmem:[#allocation3 + $0xa8] sm:$0xff]  ;;  %v547_v43 = vld [vmem:[#allocation3 + $0x1c0] sm:$0xff] }
 0x337   :  { %1233 = vmatpush1.bf16.msra.mxu1 %v1232_v49  ;;  %v514_v49 = vld [vmem:[#allocation3 + $0xb8] sm:$0xff] }
 0x338   :  { %1235 = vmatprep.subr.bf16.mxu1 %v1234_v54  ;;  %v1146_v51 = vpack.c.bf16 %v514_v49, %v512_v48  ;;  %v516_v54 = vld [vmem:[#allocation3 + $0xc8] sm:$0xff]  ;;  %v551_v49 = vld [vmem:[#allocation3 + $0x1e0] sm:$0xff] }
 0x33b   :  { %1237 = vmatpush1.bf16.msra.mxu1 %v1236_v55  ;;  %v518_v55 = vld [vmem:[#allocation3 + $0xd8] sm:$0xff] }
 0x33c   :  { %1239 = vmatprep.subr.bf16.mxu1 %v1238_v60  ;;  %v1150_v57 = vpack.c.bf16 %v518_v55, %v516_v54  ;;  %v520_v60 = vld [vmem:[#allocation3 + $0xe8] sm:$0xff]  ;;  %v775_v55 = vld [vmem:[%s1683_s12] sm:$0xff] }
 0x33d   :  { %v792_v54 = vld [vmem:[%s1683_s12 + $0x88] sm:$0xff] }
 0x33f   :  { %1241 = vmatpush1.bf16.msra.mxu1 %v1240_v61  ;;  %v522_v61 = vld [vmem:[#allocation3 + $0xf8] sm:$0xff] }
 0x340   :  { %1243 = vmatprep.subr.bf16.mxu1 %v1242_v3  ;;  %v1154_v63 = vpack.c.bf16 %v522_v61, %v520_v60  ;;  %v524_v3 = vld [vmem:[#allocation3 + $0x108] sm:$0xff]  ;;  %v777_v61 = vld [vmem:[%s1683_s12 + $0x10] sm:$0xff] }
 0x343   :  { %1245 = vmatpush1.bf16.msra.mxu1 %v1244_v4  ;;  %v526_v4 = vld [vmem:[#allocation3 + $0x118] sm:$0xff] }
 0x344   :  { %1247 = vmatprep.subr.bf16.mxu1 %v1246_v9  ;;  %v1158_v6 = vpack.c.bf16 %v526_v4, %v524_v3  ;;  %v528_v9 = vld [vmem:[#allocation3 + $0x128] sm:$0xff]  ;;  %v779_v4 = vld [vmem:[%s1683_s12 + $0x20] sm:$0xff] }
 0x347   :  { %1249 = vmatpush1.bf16.msra.mxu1 %v1248_v10  ;;  %v530_v10 = vld [vmem:[#allocation3 + $0x138] sm:$0xff] }
 0x348   :  { %1251 = vmatprep.subr.bf16.mxu1 %v1250_v15  ;;  %v1162_v12 = vpack.c.bf16 %v530_v10, %v528_v9  ;;  %v532_v15 = vld [vmem:[#allocation3 + $0x148] sm:$0xff]  ;;  %v781_v10 = vld [vmem:[%s1683_s12 + $0x30] sm:$0xff] }
 0x34b   :  { %1253 = vmatpush1.bf16.msra.mxu1 %v1252_v16  ;;  %v534_v16 = vld [vmem:[#allocation3 + $0x158] sm:$0xff] }
 0x34e   :  { %767 = vmatmul.mubr.f32.vlgmr.msra.gmra.mrb[2].mxu1 %v489_v18  ;;  %v1166_v18 = vpack.c.bf16 %v534_v16, %v532_v15  ;;  %v783_v16 = vld [vmem:[%s1683_s12 + $0x40] sm:$0xff] }
 0x3e1   :  { %v399_v28 = vpop.f32.mrb[0].mxu1 }
 0x3e2   :  { %v1091_v31 = vpop.f32.mrb[1].mxu1  ;;  %1101 = vmatmul.mubr.msk.f32.vlgmr.msra.gmra.mrb[6].mxu0 %vm78_vm1, %v399_v28  ;;  %v542_v28 = vld [vmem:[#allocation3 + $0x198] sm:$0xff] }
 0x3e3   :  { %1129 = vmatpush1.bf16.msra.mxu0 %v1128_v23  ;;  %695 = vmatprep.mubr.f32.mxu0 %v488_v27  ;;  %v1168_v23 = vpack.c.bf16 %v533_v20, %v531_v19  ;;  %v540_v27 = vld [vmem:[#allocation3 + $0x188] sm:$0xff]  ;;  %v539_v31 = vld [vmem:[#allocation3 + $0x180] sm:$0xff]  ;;  %v802_v19 = vld [vmem:[%s1683_s12 + $0xd8] sm:$0xff] }
 0x3e4   :  { %1131 = vmatprep.subr.bf16.mxu0 %v1130_v24  ;;  %v1170_v24 = vpack.c.bf16 %v538_v22, %v536_v21  ;;  %v1174_v30 = vpack.c.bf16 %v542_v28, %v540_v27  ;;  %v785_v22 = vld [vmem:[%s1683_s12 + $0x50] sm:$0xff]  ;;  %v1278_v27 = vpack.c.bf16 %v804_v26, %v803_v25  ;;  %v787_v28 = vld [vmem:[%s1683_s12 + $0x60] sm:$0xff] }
 0x3e7   :  { %1133 = vmatpush1.bf16.msra.mxu0 %v1132_v32  ;;  %v541_v32 = vld [vmem:[#allocation3 + $0x190] sm:$0xff] }
 0x3e8   :  { %1135 = vmatprep.subr.bf16.mxu0 %v1134_v33  ;;  %v544_v33 = vld [vmem:[#allocation3 + $0x1a8] sm:$0xff]  ;;  %v1176_v35 = vpack.c.bf16 %v541_v32, %v539_v31  ;;  %v805_v32 = vld [vmem:[%s1683_s12 + $0xf0] sm:$0xff] }
 0x3e9   :  { %v1178_v36 = vpack.c.bf16 %v546_v34, %v544_v33  ;;  %v806_v33 = vld [vmem:[%s1683_s12 + $0xf8] sm:$0xff] }
 0x3eb   :  { %1137 = vmatpush1.bf16.msra.mxu0 %v1136_v38  ;;  %v545_v38 = vld [vmem:[#allocation3 + $0x1b0] sm:$0xff] }
 0x3ec   :  { %1139 = vmatprep.subr.bf16.mxu0 %v1138_v39  ;;  %v548_v39 = vld [vmem:[#allocation3 + $0x1c8] sm:$0xff]  ;;  %v1180_v41 = vpack.c.bf16 %v545_v38, %v543_v37  ;;  %v790_v37 = vld [vmem:[%s1683_s12 + $0x78] sm:$0xff] }
 0x3ed   :  { %v1182_v42 = vpack.c.bf16 %v550_v40, %v548_v39 }
 0x3ef   :  { %1141 = vmatpush1.bf16.msra.mxu0 %v1140_v44  ;;  %v549_v44 = vld [vmem:[#allocation3 + $0x1d0] sm:$0xff] }
 0x3f0   :  { %1143 = vmatprep.subr.bf16.mxu0 %v1142_v45  ;;  %v552_v45 = vld [vmem:[#allocation3 + $0x1e8] sm:$0xff]  ;;  %v1184_v47 = vpack.c.bf16 %v549_v44, %v547_v43  ;;  %v619_v44 = vld [vmem:[%s1682_s11] sm:$0x3] }
 0x3f1   :  { %v1186_v48 = vpack.c.bf16 %v554_v46, %v552_v45 }
 0x3f3   :  { %1145 = vmatpush1.bf16.msra.mxu0 %v1144_v50  ;;  %v553_v50 = vld [vmem:[#allocation3 + $0x1f0] sm:$0xff] }
 0x3f4   :  { %1147 = vmatprep.subr.bf16.mxu0 %v1146_v51  ;;  %v1188_v51 = vpack.c.bf16 %v553_v50, %v551_v49 }
 0x3f7   :  { %1149 = vmatpush1.bf16.msra.mxu0 %v1148_v56  ;;  %v1254_v56 = vpack.c.bf16 %v792_v54, %v791_v53 }
 0x3f8   :  { %1151 = vmatprep.subr.bf16.mxu0 %v1150_v57  ;;  %v776_v57 = vld [vmem:[%s1683_s12 + $0x8] sm:$0xff] }
 0x3f9   :  { %v1256_v59 = vpack.c.bf16 %v776_v57, %v775_v55  ;;  %1255 = vmatprep.subr.bf16.mxu1 %v1254_v56  ;;  %v999_v57 = vld [vmem:[%s1680_s9] ss:$0 sm:$0xff] }
 0x3fb   :  { %1153 = vmatpush1.bf16.msra.mxu0 %v1152_v62  ;;  %v778_v62 = vld [vmem:[%s1683_s12 + $0x18] sm:$0xff]  ;;  %1257 = vmatpush3.bf16.msra.mxu1 %v1256_v59 }
 0x3fc   :  { %1155 = vmatprep.subr.bf16.mxu0 %v1154_v63  ;;  %v795_v63 = vld [vmem:[%s1683_s12 + $0xa0] sm:$0xff]  ;;  %v1260_v2 = vpack.c.bf16 %v778_v62, %v777_v61 }
 0x3fd   :  { %v1262_v3 = vpack.c.bf16 %v796_v0, %v795_v63 }
 0x3ff   :  { %1157 = vmatpush1.bf16.msra.mxu0 %v1156_v5  ;;  %v780_v5 = vld [vmem:[%s1683_s12 + $0x28] sm:$0xff] }
 0x400   :  { %1159 = vmatprep.subr.bf16.mxu0 %v1158_v6  ;;  %v797_v6 = vld [vmem:[%s1683_s12 + $0xb0] sm:$0xff]  ;;  %v1264_v8 = vpack.c.bf16 %v780_v5, %v779_v4 }
 0x401   :  { %v1266_v9 = vpack.c.bf16 %v798_v7, %v797_v6 }
 0x403   :  { %1161 = vmatpush1.bf16.msra.mxu0 %v1160_v11  ;;  %v782_v11 = vld [vmem:[%s1683_s12 + $0x38] sm:$0xff] }
 0x404   :  { %1163 = vmatprep.subr.bf16.mxu0 %v1162_v12  ;;  %v799_v12 = vld [vmem:[%s1683_s12 + $0xc0] sm:$0xff]  ;;  %v1268_v14 = vpack.c.bf16 %v782_v11, %v781_v10 }
 0x405   :  { %v1270_v15 = vpack.c.bf16 %v800_v13, %v799_v12 }
 0x407   :  { %1165 = vmatpush1.bf16.msra.mxu0 %v1164_v17  ;;  %v784_v17 = vld [vmem:[%s1683_s12 + $0x48] sm:$0xff] }
 0x408   :  { %1167 = vmatprep.subr.bf16.mxu0 %v1166_v18  ;;  %v801_v18 = vld [vmem:[%s1683_s12 + $0xd0] sm:$0xff]  ;;  %v1272_v20 = vpack.c.bf16 %v784_v17, %v783_v16 }
 0x409   :  { %v1274_v21 = vpack.c.bf16 %v802_v19, %v801_v18 }
 0x40b   :  { %1169 = vmatpush1.bf16.msra.mxu0 %v1168_v23  ;;  %v786_v23 = vld [vmem:[%s1683_s12 + $0x58] sm:$0xff] }
 0x40c   :  { %1171 = vmatprep.subr.bf16.mxu0 %v1170_v24  ;;  %v1276_v24 = vpack.c.bf16 %v786_v23, %v785_v22 }
 0x40f   :  { %1173 = vmatpush1.bf16.msra.mxu0 %v1172_v29  ;;  %v788_v29 = vld [vmem:[%s1683_s12 + $0x68] sm:$0xff] }
 0x410   :  { %1175 = vmatprep.subr.bf16.mxu0 %v1174_v30  ;;  %v1280_v30 = vpack.c.bf16 %v788_v29, %v787_v28 }
 0x413   :  { %1177 = vmatpush1.bf16.msra.mxu0 %v1176_v35  ;;  %v1282_v35 = vpack.c.bf16 %v806_v33, %v805_v32 }
 0x414   :  { %1179 = vmatprep.subr.bf16.mxu0 %v1178_v36  ;;  %v789_v36 = vld [vmem:[%s1683_s12 + $0x70] sm:$0xff] }
 0x415   :  { %v1284_v38 = vpack.c.bf16 %v790_v37, %v789_v36 }
 0x417   :  { %1181 = vmatpush1.bf16.msra.mxu0 %v1180_v41  ;;  %v621_v41 = vlaneseq }
 0x418   :  { %1183 = vmatprep.subr.bf16.mxu0 %v1182_v42 }
 0x419   :  { %v622_v42 = vshrl.u32 %v621_v41, 7 }
 0x41b   :  { %1185 = vmatpush1.bf16.msra.mxu0 %v1184_v47  ;;  %v623_v43 = vsub.s32 0, %v622_v42  ;;  %v627_v45 = vsub.s32 1, %v622_v42 }
 0x41c   :  { %1187 = vmatprep.subr.bf16.mxu0 %v1186_v48 }
 0x41d   :  { %v624_v46 = vrot.slane %v619_v44, %v623_v43  ;;  %v628_v47 = vrot.slane %v619_v44, %v627_v45 }
 0x41f   :  { %1189 = vmatpush1.bf16.msra.mxu0 %v1188_v51 }
 0x420   :  { %1103 = vmatprep.subr.mxu0 %v1359_v1 }
 0x421   :  { %v768_v31 = vpop.f32.mrb[2].mxu1 }
 0x422   :  { %696 = vmatmul.mubr.f32.vlgmr.msra.gmra.mrb[8].mxu0 %v487_v52  ;;  %v770_v34 = vpop.f32.mrb[3].mxu1 }
 0x423   :  { %1105 = vmatprep.mubr.msk.f32.mxu0 %vm1358_vm0, %v1359_v1  ;;  %v793_v1 = vld [vmem:[%s1683_s12 + $0x90] sm:$0xff] }
 0x424   :  { %v1258_v60 = vpack.c.bf16 %v794_v58, %v793_v1  ;;  %v1001_v1 = vld [vmem:[%s1684_s13] ss:$0 sm:$0xff] }
 0x426   :  { %1259 = vmatprep.subr.bf16.mxu1 %v1258_v60 }
 0x427   :  { %1261 = vmatpush3.bf16.msra.mxu1 %v1260_v2 }
 0x428   :  { %1263 = vmatprep.subr.bf16.mxu1 %v1262_v3 }
 0x42b   :  { %1265 = vmatpush3.bf16.msra.mxu1 %v1264_v8  ;;  %v898_v8 = vstv %s1685_s14 }
 0x42c   :  { %1267 = vmatprep.subr.bf16.mxu1 %v1266_v9 }
 0x42f   :  { %1269 = vmatpush3.bf16.msra.mxu1 %v1268_v14 }
 0x430   :  { %1271 = vmatprep.subr.bf16.mxu1 %v1270_v15 }
 0x433   :  { %1273 = vmatpush3.bf16.msra.mxu1 %v1272_v20 }
 0x434   :  { %1275 = vmatprep.subr.bf16.mxu1 %v1274_v21 }
 0x437   :  { %1277 = vmatpush3.bf16.msra.mxu1 %v1276_v24 }
 0x438   :  { %1279 = vmatprep.subr.bf16.mxu1 %v1278_v27 }
 0x43b   :  { %1281 = vmatpush3.bf16.msra.mxu1 %v1280_v30 }
 0x43c   :  { %1283 = vmatprep.subr.bf16.mxu1 %v1282_v35 }
 0x43f   :  { %1285 = vmatpush3.bf16.msra.mxu1 %v1284_v38 }
 0x4b5   :  { %v483_v39 = vpop.f32.mrb[6].mxu0 }
 0x4b6   :  { %v1102_v40 = vpop.f32.mrb[7].mxu0  ;;  %v484_v60 = vadd.f32 %v999_v57, %v483_v39 }
 0x4b8   :  { %v884_v0 = vmul.f32 %v484_v60, %v484_v60 }
 0x4ba   :  { %v886_v2 = vsel %vm885_vm6, %v884_v0, 0.0 }
 0x4f5   :  { %v697_v48 = vpop.f32.mrb[8].mxu0 }
 0x4f6   :  { %v698_v49 = vadd.f32 %v697_v48, %v624_v46  ;;  %v699_v50 = vpop.f32.mrb[9].mxu0 }
 0x4f7   :  { %v700_v51 = vadd.f32 %v699_v50, %v628_v47 }
 0x4f8   :  { %v769_v52 = vadd.f32 %v768_v31, %v698_v49 }
 0x4f9   :  { %v771_v53 = vadd.f32 %v770_v34, %v700_v51 }
 0x4fa   :  { %v773_v55 = vmax.f32 %v769_v52, 0.0 }
 0x4fb   :  { %v774_v54 = vmax.f32 %v771_v53, 0.0 }
 0x4fd   :  { %878 = vmatprep.mubr.f32.mxu1 %v774_v54 }
 0x4fe   :  { %879 = vmatmul.mubr.f32.vlgmr.msra.gmra.mrb[4].mxu1 %v773_v55 }
 0x5d1   :  { %v1055_v56 = vpop.f32.mrb[4].mxu1 }
 0x5d2   :  { %v1056_v58 = vpop.f32.mrb[5].mxu1 }
 0x5d3   :  { %v1057_v59 = vadd.f32 %v1056_v58, %v1055_v56 }
 0x5d5   :  { %v881_v61 = vadd.f32 %v1057_v59, %v1001_v1 }
 0x5d7   :  { %v891_v62 = vmul.f32 %v881_v61, %v881_v61 }
 0x5d9   :  { %v892_v63 = vsel %vm885_vm6, %v891_v62, 0.0 }
 0x5da   :  { %893 = vadd.xlane.f32.xlu1 %v892_v63 }
 0x5de   :  { %887 = vadd.xlane.f32.xlu1 %v886_v2 }
 0x667   :  { %v894_v3 = vpop.xlane.xlu1 %893 }
 0x668   :  { %1302 = vrsqrt.f32 %v894_v3 }
 0x66b   :  { %v888_v4 = vpop.xlane.xlu1 %887 }
 0x66c   :  { %1304 = vrsqrt.f32 %v888_v4 }
 0x672   :  { %v1303_v5 = vpop.eup %1302 }
 0x673   :  { %v896_v6 = vmul.f32 %v1303_v5, %v881_v61 }
 0x675   :  { %1104 = vmatpush3.xpose.msk.msra.mxu0 %vm885_vm6, %v896_v6 }
 0x676   :  { %v1305_v7 = vpop.eup %1304 }
 0x677   :  { %v890_v9 = vmul.f32 %v1305_v7, %v484_v60 }
 0x679   :  { %v899_v10 = vmul.f32 %v898_v8, %v890_v9 }
 0x67b   :  { %1106 = vmatmul.mubr.msk.f32.vlgmr.msra.gmra.mrb[10].mxu0 %vm885_vm6, %v899_v10 }
 0x74e   :  { %v972_v11 = vpop.f32.mrb[10].mxu0 }
 0x74f   :  { %976 = vst.msk [vmem:[#allocation6] sm:$0xff] %vm318_vm5, %v972_v11  ;;  %v1107_v12 = vpop.f32.mrb[11].mxu0 }
 0x750   :  { %1339 = shalt.err (!%p1336_p12)
}
 0x751   :  { %s1340_s4 = scalar_lea.hbm %s1686_s15, 128 }
 0x752   :  { %p1341_p13 = scmp.ne.s32.totalorder %s1686_s15, %s1340_s4  ;;  %p1344_p0 = scmp.lt.u32.totalorder %s1340_s4, %s1686_s15 }
 0x754   :  { %p1346_p1 = pnand %p1344_p0, %p1341_p13 }
 0x756   :  { %1349 = shalt.err (!%p1346_p1)
}
 0x757   :  { %986 = dma.vmem_to_hbm [thread:$0]  %s984_s28, 128, %s1686_s15, [#allocation5]  }
 0x758   :  { %1352 = dma.done.wait [#allocation5], 128  }
 0x759   :  { %1353 = vsyncadd [#allocation5], 4294967168 }
 0x75a   :  { %990 = vsyncpa [#allocation4], 1 }
 0x75b   :  { %991 = vsyncpa [#allocation5], 1 }

</bundles_post_ra>
